<compile_context>
chip_gen: v5e
topology: v5e:2x2
jax: 0.10.0
libtpu: 0.0.40
codegen_flags: <defaults>
</compile_context>

<pallas_src>
import jax
import jax.numpy as jnp
from jax import lax
from jax.experimental import pallas as pl
from jax.experimental.pallas import tpu as pltpu


def _round_up(x, m):
    return (x + m - 1) // m * m


def _vmem_capacity_bytes():
    """Per-core VMEM capacity; conservative fallback if the query fails."""
    try:
        info = pltpu.get_tpu_info()
        cap = getattr(info, "vmem_capacity_bytes", None)
        if cap:
            return int(cap)
    except Exception:
        pass
    return 64 << 20  # v7x per-TensorCore VMEM (smallest of the three gens)


# --------------------------------------------------------------------------
# Kernels
# --------------------------------------------------------------------------

def _tile_logits_update_lse(x_ref, w_ref, b_ref, m_sc, l_sc):
    """(tm, tv) logits tile on the MXU + online running max / sum-exp update."""
    # Contract x (tm, d) with W (tv, d) along d; f32 accumulation, operands in
    # their native dtype (f32 or bf16 -- no upcast).
    logits = lax.dot_general(
        x_ref[...], w_ref[...],
        dimension_numbers=(((1,), (1,)), ((), ())),
        preferred_element_type=jnp.float32,
    ) + b_ref[...].astype(jnp.float32)

    m_prev = m_sc[...]
    m_new = jnp.maximum(m_prev, jnp.max(logits, axis=-1, keepdims=True))
    l_sc[...] = l_sc[...] * jnp.exp(m_prev - m_new) + jnp.sum(
        jnp.exp(logits - m_new), axis=-1, keepdims=True)
    m_sc[...] = m_new
    return logits


def _resident_kernel(x_ref, w_ref, b_ref, o_ref, m_sc, l_sc):
    # x_ref: (tm, d)  w_ref: (tv, d)  b_ref: (1, tv)
    # o_ref: (tm, vocab_p) f32, VMEM-resident across the vocab loop.
    j = pl.program_id(1)

    @pl.when(j == 0)
    def _():
        m_sc[...] = jnp.full(m_sc.shape, -jnp.inf, dtype=jnp.float32)
        l_sc[...] = jnp.zeros(l_sc.shape, dtype=jnp.float32)

    logits = _tile_logits_update_lse(x_ref, w_ref, b_ref, m_sc, l_sc)

    # Stash raw logits into the resident output block (doubles as the logits
    # scratch -- zero extra VMEM).  tv is always a multiple of 128.
    tv = logits.shape[-1]
    col = pl.multiple_of(j * tv, 128)
    o_ref[:, pl.ds(col, tv)] = logits

    # Last vocab tile: normalize the whole row block once.
    @pl.when(j == pl.num_programs(1) - 1)
    def _():
        lse = m_sc[...] + jnp.log(l_sc[...])          # (tm, 1)
        o_ref[...] = o_ref[...] - lse


def _logits_lse_kernel(x_ref, w_ref, b_ref, logits_ref, lse_ref, m_sc, l_sc):
    # Pass 1 of the two-pass schedule: stream raw logits tiles to HBM and
    # keep only the tiny running LSE resident.
    j = pl.program_id(1)

    @pl.when(j == 0)
    def _():
        m_sc[...] = jnp.full(m_sc.shape, -jnp.inf, dtype=jnp.float32)
        l_sc[...] = jnp.zeros(l_sc.shape, dtype=jnp.float32)

    logits_ref[...] = _tile_logits_update_lse(x_ref, w_ref, b_ref, m_sc, l_sc)

    @pl.when(j == pl.num_programs(1) - 1)
    def _():
        lse_ref[...] = m_sc[...] + jnp.log(l_sc[...])


def _normalize_kernel(logits_ref, lse_ref, o_ref):
    # Pass 2: streaming subtract at HBM bandwidth.
    o_ref[...] = logits_ref[...] - lse_ref[...]


# --------------------------------------------------------------------------
# Wrapper
# --------------------------------------------------------------------------

def generator_forward(x, weight, bias, *, compute_dtype=None, tm=None, tv=None,
                      two_pass=None):
    """log_softmax(x @ weight.T + bias, axis=-1).

    x: (..., d_model); weight: (vocab, d_model) [PyTorch nn.Linear layout];
    bias: (vocab,).  Returns (..., vocab) float32 log-probabilities.

    compute_dtype: optional dtype (e.g. jnp.bfloat16) for the MXU operands
    (f32 accumulation is kept).  two_pass: None = auto (by VMEM budget).
    """
    d_model = x.shape[-1]
    vocab = weight.shape[0]
    lead = x.shape[:-1]

    x2d = x.reshape(-1, d_model)
    M = x2d.shape[0]

    if compute_dtype is not None:
        # NOTE: in a real model the weight would already live in compute_dtype
        # (e.g. bf16); this cast is a one-time XLA op, not per-tile work.
        x2d = x2d.astype(compute_dtype)
        weight = weight.astype(compute_dtype)

    x_item = jnp.dtype(x2d.dtype).itemsize
    w_item = jnp.dtype(weight.dtype).itemsize

    # ---- generation-aware VMEM budget -------------------------------------
    vmem_cap = _vmem_capacity_bytes()
    vmem_budget = min(int(vmem_cap * 3 // 4), 96 << 20)   # ~48 MiB v7x, ~96 MiB v5e/v6e

    # ---- row tile: keep >= 256 (full MXU pass on v6e/v7x); never shrink it
    # to fit a resident output block -- that is what the two-pass path is for.
    if tm is None:
        tm = 256
    tm_eff = max(8, min(tm, _round_up(M, 8)))
    tm_eff = _round_up(tm_eff, 8)

    # ---- vocab tile: multiple of 128 (prefer >= 256 for the 256x256 MXU),
    # dividing vocab_p = round_up(vocab, 128) (minimal padding), with the
    # double-buffered weight block kept within ~budget/3.
    vocab_p = _round_up(vocab, 128)
    if tv is None:
        weight_budget = vmem_budget // 3
        tv_eff = 128
        for cand in (1024, 768, 640, 512, 384, 256):
            if vocab_p % cand == 0 and 2 * cand * d_model * w_item <= weight_budget:
                tv_eff = cand
                break
    else:
        assert tv % 128 == 0
        tv_eff = tv
        vocab_p = _round_up(vocab, tv_eff)
    tv_eff = min(tv_eff, vocab_p)

    # ---- pad vocab only when needed (weight keeps its PyTorch layout) ------
    if vocab_p != vocab:
        pad = vocab_p - vocab
        weight_in = jnp.pad(weight, ((0, pad), (0, 0)))
        # padded logits = 0 + (-1e30): contribute nothing to max / sum-exp.
        # (output stays f32, so -1e30 never overflows to -inf.)
        bias_in = jnp.pad(bias.astype(jnp.float32), (0, pad),
                          constant_values=-1e30)
    else:
        weight_in = weight
        bias_in = bias.astype(jnp.float32)
    bias2d = bias_in.reshape(1, vocab_p)

    n_row_blocks = pl.cdiv(M, tm_eff)
    n_vocab_blocks = vocab_p // tv_eff

    # Double-buffered input blocks + scratch + slack.
    common = (2 * tm_eff * d_model * x_item          # x blocks
              + 2 * tv_eff * d_model * w_item        # weight blocks
              + 2 * tv_eff * 4                       # bias blocks
              + 2 * tm_eff * 4                       # m/l scratch
              + (2 << 20))                           # slack
    resident_bytes = 2 * tm_eff * vocab_p * 4        # resident (tm, vocab_p) out

    if two_pass is None:
        two_pass = (common + resident_bytes) > vmem_budget

    in_specs = [
        pl.BlockSpec((tm_eff, d_model), lambda i, j: (i, 0)),
        pl.BlockSpec((tv_eff, d_model), lambda i, j: (j, 0)),
        pl.BlockSpec((1, tv_eff), lambda i, j: (0, j)),
    ]
    matmul_cost = pl.CostEstimate(
        flops=int(2 * M * vocab_p * d_model),
        transcendentals=int(M * vocab_p),
        bytes_accessed=int(M * d_model * x_item
                           + int(n_row_blocks) * vocab_p * d_model * w_item
                           + M * vocab_p * 4),
    )

    if not two_pass:
        # ---- single-pass: (tm, vocab_p) block resident in VMEM -------------
        est = common + resident_bytes
        out = pl.pallas_call(
            _resident_kernel,
            out_shape=jax.ShapeDtypeStruct((M, vocab_p), jnp.float32),
            grid_spec=pltpu.PrefetchScalarGridSpec(
                num_scalar_prefetch=0,
                grid=(n_row_blocks, n_vocab_blocks),
                in_specs=in_specs,
                out_specs=pl.BlockSpec((tm_eff, vocab_p), lambda i, j: (i, 0)),
                scratch_shapes=[
                    pltpu.VMEM((tm_eff, 1), jnp.float32),   # running max
                    pltpu.VMEM((tm_eff, 1), jnp.float32),   # running sum-exp
                ],
            ),
            compiler_params=pltpu.CompilerParams(
                dimension_semantics=("parallel", "arbitrary"),
                vmem_limit_bytes=int(min(max(est, 32 << 20), vmem_budget)),
            ),
            cost_estimate=matmul_cost,
        )(x2d, weight_in, bias2d)
    else:
        # ---- two-pass: logits tiles streamed to HBM, then normalized -------
        est1 = common + 2 * tm_eff * tv_eff * 4 + 2 * tm_eff * 4
        logits, lse = pl.pallas_call(
            _logits_lse_kernel,
            out_shape=(jax.ShapeDtypeStruct((M, vocab_p), jnp.float32),
                       jax.ShapeDtypeStruct((M, 1), jnp.float32)),
            grid_spec=pltpu.PrefetchScalarGridSpec(
                num_scalar_prefetch=0,
                grid=(n_row_blocks, n_vocab_blocks),
                in_specs=in_specs,
                out_specs=[
                    pl.BlockSpec((tm_eff, tv_eff), lambda i, j: (i, j)),
                    pl.BlockSpec((tm_eff, 1), lambda i, j: (i, 0)),
                ],
                scratch_shapes=[
                    pltpu.VMEM((tm_eff, 1), jnp.float32),
                    pltpu.VMEM((tm_eff, 1), jnp.float32),
                ],
            ),
            compiler_params=pltpu.CompilerParams(
                dimension_semantics=("parallel", "arbitrary"),
                vmem_limit_bytes=int(min(max(est1, 32 << 20), vmem_budget)),
            ),
            cost_estimate=matmul_cost,
        )(x2d, weight_in, bias2d)

        # Wider lane tiles for the memory-bound finalize (fewer grid steps).
        tv2 = tv_eff
        while (tv2 * 2 <= vocab_p and vocab_p % (tv2 * 2) == 0
               and 6 * tm_eff * (tv2 * 2) * 4 <= (24 << 20)):
            tv2 *= 2
        out = pl.pallas_call(
            _normalize_kernel,
            out_shape=jax.ShapeDtypeStruct((M, vocab_p), jnp.float32),
            grid_spec=pltpu.PrefetchScalarGridSpec(
                num_scalar_prefetch=0,
                grid=(n_row_blocks, vocab_p // tv2),
                in_specs=[
                    pl.BlockSpec((tm_eff, tv2), lambda i, j: (i, j)),
                    pl.BlockSpec((tm_eff, 1), lambda i, j: (i, 0)),
                ],
                out_specs=pl.BlockSpec((tm_eff, tv2), lambda i, j: (i, j)),
            ),
            compiler_params=pltpu.CompilerParams(
                dimension_semantics=("parallel", "parallel"),
                vmem_limit_bytes=32 << 20,
            ),
            cost_estimate=pl.CostEstimate(
                flops=int(M * vocab_p),
                transcendentals=0,
                bytes_accessed=int(2 * M * vocab_p * 4 + M * 4),
            ),
        )(logits, lse)

    if vocab_p != vocab:
        # TODO(synk): fuse the downstream NLL / label-smoothing loss so the
        # padded (M, vocab_p) log-prob matrix never round-trips HBM.
        out = out[:, :vocab]
    return out.reshape(*lead, vocab)


# --------------------------------------------------------------------------
# Self-test
# --------------------------------------------------------------------------

if __name__ == "__main__":
    key = jax.random.PRNGKey(0)

    def make_params(k, d_model, vocab):
        kw, kb = jax.random.split(k)
        bound = 1.0 / (d_model ** 0.5)
        w = jax.random.uniform(kw, (vocab, d_model), minval=-bound, maxval=bound,
                               dtype=jnp.float32)
        b = jax.random.uniform(kb, (vocab,), minval=-bound, maxval=bound,
                               dtype=jnp.float32)
        return w, b

    def check(x, w, b, atol=2e-5, rtol=2e-5, **kw):
        out = jax.block_until_ready(generator_forward(x, w, b, **kw))
        ref = jax.nn.log_softmax(x @ w.T + b, axis=-1)
        assert out.shape == ref.shape, (out.shape, ref.shape)
        err = float(jnp.max(jnp.abs(out - ref)))
        assert jnp.allclose(out, ref, atol=atol, rtol=rtol), err

    # Case 1: small aligned shapes (batch=2, seq=8, d_model=32, vocab=128).
    k1, k2, key = jax.random.split(key, 3)
    x = jax.random.normal(k1, (2, 8, 32), dtype=jnp.float32)
    w, b = make_params(k2, 32, 128)
    check(x, w, b)

    # Case 2: vocab not a multiple of 128 -> exercises the padding path.
    k1, k2, key = jax.random.split(key, 3)
    x = jax.random.normal(k1, (2, 8, 32), dtype=jnp.float32)
    w, b = make_params(k2, 32, 200)
    check(x, w, b)

    # Case 3: multiple vocab tiles -> online-LSE loop, resident single-pass.
    k1, k2, key = jax.random.split(key, 3)
    x = jax.random.normal(k1, (2, 8, 32), dtype=jnp.float32)
    w, b = make_params(k2, 32, 512)
    check(x, w, b, tv=128)

    # Case 4: forced two-pass schedule (logits streamed to HBM + finalize).
    k1, k2, key = jax.random.split(key, 3)
    x = jax.random.normal(k1, (2, 8, 32), dtype=jnp.float32)
    w, b = make_params(k2, 32, 512)
    check(x, w, b, tv=128, two_pass=True)

    # Case 5: bf16 MXU operands (f32 accumulation) -> looser tolerance.
    k1, k2, key = jax.random.split(key, 3)
    x = jax.random.normal(k1, (2, 8, 32), dtype=jnp.float32)
    w, b = make_params(k2, 32, 512)
    check(x, w, b, compute_dtype=jnp.bfloat16, atol=3e-2, rtol=3e-2)

    print("KERNEL_OK")
</pallas_src>

<mosaic_0001>
module attributes {stable_mosaic.version = 11 : i64} {
  func.func @_resident_kernel(%arg0: i32, %arg1: i32, %arg2: memref<16x32xf32, #tpu.memory_space<vmem>>, %arg3: memref<128x32xf32, #tpu.memory_space<vmem>>, %arg4: memref<1x128xf32, #tpu.memory_space<vmem>>, %arg5: memref<16x128xf32, #tpu.memory_space<vmem>>, %arg6: memref<16x1xf32, #tpu.memory_space<vmem>>, %arg7: memref<16x1xf32, #tpu.memory_space<vmem>>) attributes {dimension_semantics = [#tpu.dimension_semantics<parallel>, #tpu.dimension_semantics<arbitrary>], iteration_bounds = array<i64: 1, 1>, scalar_prefetch = 0 : i64, scratch_operands = 2 : i64, tpu.core_type = #tpu.core_type<tc>, window_params = [{transform_indices = @transform_0, window_bounds = array<i64: 16, 32>}, {transform_indices = @transform_1, window_bounds = array<i64: 128, 32>}, {transform_indices = @transform_2, window_bounds = array<i64: 1, 128>}, {transform_indices = @transform_3, window_bounds = array<i64: 16, 128>}]} {
    %c0_i32 = arith.constant 0 : i32
    %0 = arith.cmpi eq, %arg1, %c0_i32 : i32
    %1 = arith.extui %0 : i1 to i32
    %c0_i32_0 = arith.constant 0 : i32
    %2 = arith.cmpi ne, %1, %c0_i32_0 : i32
    scf.if %2 {
      %cst_19 = arith.constant 0xFF800000 : f32
      %32 = vector.broadcast %cst_19 : f32 to vector<16x1xf32>
      %c0_20 = arith.constant 0 : index
      %c0_21 = arith.constant 0 : index
      %33 = vector.load %arg6[%c0_20, %c0_21] : memref<16x1xf32, #tpu.memory_space<vmem>>, vector<16x1xf32>
      tpu.vector_store %arg6[%c0_20, %c0_21], %32 {strides = array<i32>} : memref<16x1xf32, #tpu.memory_space<vmem>>, vector<16x1xf32>,
      %cst_22 = arith.constant 0.000000e+00 : f32
      %34 = vector.broadcast %cst_22 : f32 to vector<16x1xf32>
      %c0_23 = arith.constant 0 : index
      %c0_24 = arith.constant 0 : index
      %35 = vector.load %arg7[%c0_23, %c0_24] : memref<16x1xf32, #tpu.memory_space<vmem>>, vector<16x1xf32>
      tpu.vector_store %arg7[%c0_23, %c0_24], %34 {strides = array<i32>} : memref<16x1xf32, #tpu.memory_space<vmem>>, vector<16x1xf32>,
    } else {
    }
    %c0 = arith.constant 0 : index
    %c0_1 = arith.constant 0 : index
    %3 = vector.load %arg2[%c0, %c0_1] : memref<16x32xf32, #tpu.memory_space<vmem>>, vector<16x32xf32>
    %c0_2 = arith.constant 0 : index
    %c0_3 = arith.constant 0 : index
    %4 = vector.load %arg3[%c0_2, %c0_3] : memref<128x32xf32, #tpu.memory_space<vmem>>, vector<128x32xf32>
    %cst = arith.constant dense<0.000000e+00> : vector<16x128xf32>
    %5 = tpu.matmul %3, %4, %cst {dimension_numbers = #tpu.dot_dimension_numbers<[1], [1], [0], [0], [0, 0, 1, 0], [], []>} : vector<16x32xf32>, vector<128x32xf32>, vector<16x128xf32> -> vector<16x128xf32>
    %c0_4 = arith.constant 0 : index
    %c0_5 = arith.constant 0 : index
    %6 = vector.load %arg4[%c0_4, %c0_5] : memref<1x128xf32, #tpu.memory_space<vmem>>, vector<1x128xf32>
    %7 = vector.broadcast %6 : vector<1x128xf32> to vector<16x128xf32>
    %8 = arith.addf %5, %7 : vector<16x128xf32>
    %c0_6 = arith.constant 0 : index
    %c0_7 = arith.constant 0 : index
    %9 = vector.load %arg6[%c0_6, %c0_7] : memref<16x1xf32, #tpu.memory_space<vmem>>, vector<16x1xf32>
    %cst_8 = arith.constant dense<0xFF800000> : vector<16xf32>
    %10 = vector.multi_reduction <maximumf>, %8, %cst_8 [1] : vector<16x128xf32> to vector<16xf32>
    %11 = vector.shape_cast %10 : vector<16xf32> to vector<16x1xf32>
    %12 = arith.maximumf %9, %11 : vector<16x1xf32>
    %c0_9 = arith.constant 0 : index
    %c0_10 = arith.constant 0 : index
    %13 = vector.load %arg7[%c0_9, %c0_10] : memref<16x1xf32, #tpu.memory_space<vmem>>, vector<16x1xf32>
    %14 = arith.subf %9, %12 : vector<16x1xf32>
    %15 = math.exp %14 : vector<16x1xf32>
    %16 = arith.mulf %13, %15 : vector<16x1xf32>
    %17 = vector.broadcast %12 : vector<16x1xf32> to vector<16x128xf32>
    %18 = arith.subf %8, %17 : vector<16x128xf32>
    %19 = math.exp %18 : vector<16x128xf32>
    %cst_11 = arith.constant dense<0.000000e+00> : vector<16xf32>
    %20 = vector.multi_reduction <add>, %19, %cst_11 [1] : vector<16x128xf32> to vector<16xf32>
    %21 = vector.shape_cast %20 : vector<16xf32> to vector<16x1xf32>
    %22 = arith.addf %16, %21 : vector<16x1xf32>
    %c0_12 = arith.constant 0 : index
    %c0_13 = arith.constant 0 : index
    %23 = vector.load %arg7[%c0_12, %c0_13] : memref<16x1xf32, #tpu.memory_space<vmem>>, vector<16x1xf32>
    tpu.vector_store %arg7[%c0_12, %c0_13], %22 {strides = array<i32>} : memref<16x1xf32, #tpu.memory_space<vmem>>, vector<16x1xf32>,
    %c0_14 = arith.constant 0 : index
    %c0_15 = arith.constant 0 : index
    %24 = vector.load %arg6[%c0_14, %c0_15] : memref<16x1xf32, #tpu.memory_space<vmem>>, vector<16x1xf32>
    tpu.vector_store %arg6[%c0_14, %c0_15], %12 {strides = array<i32>} : memref<16x1xf32, #tpu.memory_space<vmem>>, vector<16x1xf32>,
    %c128_i32 = arith.constant 128 : i32
    %25 = arith.muli %arg1, %c128_i32 : i32
    %26 = tpu.assume_multiple %25, 128 : i32
    %c0_16 = arith.constant 0 : index
    %27 = arith.index_cast %26 : i32 to index
    %28 = vector.load %arg5[%c0_16, %27] : memref<16x128xf32, #tpu.memory_space<vmem>>, vector<16x128xf32>
    tpu.vector_store %arg5[%c0_16, %27], %8 {strides = array<i32>} : memref<16x128xf32, #tpu.memory_space<vmem>>, vector<16x128xf32>,
    %c0_i32_17 = arith.constant 0 : i32
    %29 = arith.cmpi eq, %arg1, %c0_i32_17 : i32
    %30 = arith.extui %29 : i1 to i32
    %c0_i32_18 = arith.constant 0 : i32
    %31 = arith.cmpi ne, %30, %c0_i32_18 : i32
    scf.if %31 {
      %c0_19 = arith.constant 0 : index
      %c0_20 = arith.constant 0 : index
      %32 = vector.load %arg6[%c0_19, %c0_20] : memref<16x1xf32, #tpu.memory_space<vmem>>, vector<16x1xf32>
      %c0_21 = arith.constant 0 : index
      %c0_22 = arith.constant 0 : index
      %33 = vector.load %arg7[%c0_21, %c0_22] : memref<16x1xf32, #tpu.memory_space<vmem>>, vector<16x1xf32>
      %34 = math.log %33 : vector<16x1xf32>
      %35 = arith.addf %32, %34 : vector<16x1xf32>
      %c0_23 = arith.constant 0 : index
      %c0_24 = arith.constant 0 : index
      %36 = vector.load %arg5[%c0_23, %c0_24] : memref<16x128xf32, #tpu.memory_space<vmem>>, vector<16x128xf32>
      %37 = vector.broadcast %35 : vector<16x1xf32> to vector<16x128xf32>
      %38 = arith.subf %36, %37 : vector<16x128xf32>
      %c0_25 = arith.constant 0 : index
      %c0_26 = arith.constant 0 : index
      %39 = vector.load %arg5[%c0_25, %c0_26] : memref<16x128xf32, #tpu.memory_space<vmem>>, vector<16x128xf32>
      tpu.vector_store %arg5[%c0_25, %c0_26], %38 {strides = array<i32>} : memref<16x128xf32, #tpu.memory_space<vmem>>, vector<16x128xf32>,
    } else {
    }
    return
  }
  func.func @transform_0(%arg0: i32, %arg1: i32) -> (i32, i32) {
    %c0_i32 = arith.constant 0 : i32
    %c0_i32_0 = arith.constant 0 : i32
    return %arg0, %c0_i32 : i32, i32
  }
  func.func @transform_1(%arg0: i32, %arg1: i32) -> (i32, i32) {
    %c0_i32 = arith.constant 0 : i32
    %c0_i32_0 = arith.constant 0 : i32
    return %arg1, %c0_i32 : i32, i32
  }
  func.func @transform_2(%arg0: i32, %arg1: i32) -> (i32, i32) {
    %c0_i32 = arith.constant 0 : i32
    %c0_i32_0 = arith.constant 0 : i32
    return %c0_i32, %arg1 : i32, i32
  }
  func.func @transform_3(%arg0: i32, %arg1: i32) -> (i32, i32) {
    %c0_i32 = arith.constant 0 : i32
    %c0_i32_0 = arith.constant 0 : i32
    return %arg0, %c0_i32 : i32, i32
  }
}

</mosaic_0001>

<bundles_post_ra>
// kernel: tpu_custom_call.1
= control target key start
LH: loop header
LB: loop body
LE: loop exit
PB: predicated region body
PF: predicated region fallthrough
CT: control target
= control target key end

     0   :  { %vm46_vm0 = vcmask 261120   ;;  %s442_s0 = inlined_call_operand.vmem [shape: f32[16,32], index: 0, kind: input, shape index: {}]   ;;  %s443_s1 = inlined_call_operand.vmem [shape: f32[128,32], index: 1, kind: input, shape index: {}]   ;;  %s444_s2 = inlined_call_operand.vmem [shape: f32[1,128], index: 2, kind: input, shape index: {}]   ;;  %s445_s3 = inlined_call_operand.hbm [shape: f32[16,128], index: 3, kind: output, shape index: {}]  }
   0x1   :  { %v41_v0 = vld [vmem:[%s443_s1 + $0x78] sm:$0xff]  ;;  %v40_v1 = vld [vmem:[%s443_s1 + $0x70] sm:$0xff] }
   0x2   :  { %223 = vmatpush.xpose.msk.msra.mxu0 %vm46_vm0, %v41_v0  ;;  %241 = vmatpush.xpose.msk.msra.mxu1 %vm46_vm0, %v41_v0 }
   0x3   :  { %8 = vsyncpa [#allocation5], 0  ;;  %v39_v2 = vld [vmem:[%s443_s1 + $0x68] sm:$0xff]  ;;  %v38_v3 = vld [vmem:[%s443_s1 + $0x60] sm:$0xff]  ;;  %vm19_vm1 = vcmask 7168   ;;  %v304_v23 = vmov -inf  }
   0x4   :  { %v37_v4 = vld [vmem:[%s443_s1 + $0x58] sm:$0xff]  ;;  %v36_v5 = vld [vmem:[%s443_s1 + $0x50] sm:$0xff]  ;;  %v35_v6 = vld [vmem:[%s443_s1 + $0x48] sm:$0xff]  ;;  %20 = vst.msk [vmem:[#allocation2] sm:$0xff] %vm19_vm1, %v304_v23  ;;  %v305_v24 = vmov 0   ;;  %v306_v25 = vmov 0.0  }
   0x5   :  { %v34_v7 = vld [vmem:[%s443_s1 + $0x40] sm:$0xff]  ;;  %v33_v8 = vld [vmem:[%s443_s1 + $0x38] sm:$0xff]  ;;  %v32_v9 = vld [vmem:[%s443_s1 + $0x30] sm:$0xff]  ;;  %21 = vst.msk [vmem:[#allocation2 + $0x8] sm:$0xff] %vm19_vm1, %v304_v23  ;;  %263 = vset.pattern.permute.xlu1 %v305_v24  ;;  %264 = vset.pattern.permute.xlu0 %v305_v24  ;;  %s210_s24 = sshll.u32 %s445_s3, 4  ;;  %s308_s25 = smov 128   ;;  %s211_s24 = int_to_ptr.hbm [resolvable:$true] %s210_s24 }
   0x6   :  { %224 = vmatpush.xpose.msk.msra.mxu0 %vm46_vm0, %v40_v1  ;;  %242 = vmatpush.xpose.msk.msra.mxu1 %vm46_vm0, %v40_v1  ;;  %v31_v10 = vld [vmem:[%s443_s1 + $0x28] sm:$0xff]  ;;  %v30_v11 = vld [vmem:[%s443_s1 + $0x20] sm:$0xff]  ;;  %v29_v12 = vld [vmem:[%s443_s1 + $0x18] sm:$0xff]  ;;  %22 = vst.msk [vmem:[#allocation3] sm:$0xff] %vm19_vm1, %v306_v25  ;;  %s309_s26 = smov 8  }
   0x7   :  { %v28_v13 = vld [vmem:[%s443_s1 + $0x10] sm:$0xff]  ;;  %v27_v14 = vld [vmem:[%s443_s1 + $0x8] sm:$0xff]  ;;  %v26_v15 = vld [vmem:[%s443_s1] sm:$0xff]  ;;  %23 = vst.msk [vmem:[#allocation3 + $0x8] sm:$0xff] %vm19_vm1, %v306_v25 }
   0x8   :  { %v24_v16 = vld [vmem:[%s442_s0] sm:$0xff]  ;;  %v25_v17 = vld [vmem:[%s442_s0 + $0x8] sm:$0xff]  ;;  %s307_s0 = smov [#allocation4]  }
   0x9   :  { %v265_v18 = vld [vmem:[%s444_s2] ss:$0 sm:$0xff]  ;;  %s208_s1 = sshll.u32 %s307_s0, 4  ;;  %s209_s1 = int_to_ptr.vmem [resolvable:$true] %s208_s1 }
   0xa   :  { %225 = vmatpush.xpose.msk.msra.mxu0 %vm46_vm0, %v39_v2  ;;  %243 = vmatpush.xpose.msk.msra.mxu1 %vm46_vm0, %v39_v2 }
   0xb   :  { %v124_v26 = vld [vmem:[#allocation2] sm:$0xff] }
   0xc   :  { %v125_v30 = vld [vmem:[#allocation2 + $0x8] sm:$0xff] }
   0xd   :  { %v132_v45 = vld [vmem:[#allocation3] sm:$0xff] }
   0xe   :  { %226 = vmatpush.xpose.msk.msra.mxu0 %vm46_vm0, %v38_v3  ;;  %244 = vmatpush.xpose.msk.msra.mxu1 %vm46_vm0, %v38_v3  ;;  %v133_v50 = vld [vmem:[#allocation3 + $0x8] sm:$0xff] }
  0x12   :  { %227 = vmatpush.xpose.msk.msra.mxu0 %vm46_vm0, %v37_v4  ;;  %245 = vmatpush.xpose.msk.msra.mxu1 %vm46_vm0, %v37_v4 }
  0x16   :  { %228 = vmatpush.xpose.msk.msra.mxu0 %vm46_vm0, %v36_v5  ;;  %246 = vmatpush.xpose.msk.msra.mxu1 %vm46_vm0, %v36_v5 }
  0x1a   :  { %229 = vmatpush.xpose.msk.msra.mxu0 %vm46_vm0, %v35_v6  ;;  %247 = vmatpush.xpose.msk.msra.mxu1 %vm46_vm0, %v35_v6 }
  0x1e   :  { %230 = vmatpush.xpose.msk.msra.mxu0 %vm46_vm0, %v34_v7  ;;  %248 = vmatpush.xpose.msk.msra.mxu1 %vm46_vm0, %v34_v7 }
  0x22   :  { %231 = vmatpush.xpose.msk.msra.mxu0 %vm46_vm0, %v33_v8  ;;  %249 = vmatpush.xpose.msk.msra.mxu1 %vm46_vm0, %v33_v8 }
  0x26   :  { %232 = vmatpush.xpose.msk.msra.mxu0 %vm46_vm0, %v32_v9  ;;  %250 = vmatpush.xpose.msk.msra.mxu1 %vm46_vm0, %v32_v9 }
  0x2a   :  { %233 = vmatpush.xpose.msk.msra.mxu0 %vm46_vm0, %v31_v10  ;;  %251 = vmatpush.xpose.msk.msra.mxu1 %vm46_vm0, %v31_v10 }
  0x2e   :  { %234 = vmatpush.xpose.msk.msra.mxu0 %vm46_vm0, %v30_v11  ;;  %252 = vmatpush.xpose.msk.msra.mxu1 %vm46_vm0, %v30_v11 }
  0x32   :  { %235 = vmatpush.xpose.msk.msra.mxu0 %vm46_vm0, %v29_v12  ;;  %253 = vmatpush.xpose.msk.msra.mxu1 %vm46_vm0, %v29_v12 }
  0x36   :  { %236 = vmatpush.xpose.msk.msra.mxu0 %vm46_vm0, %v28_v13  ;;  %254 = vmatpush.xpose.msk.msra.mxu1 %vm46_vm0, %v28_v13 }
  0x3a   :  { %237 = vmatpush.xpose.msk.msra.mxu0 %vm46_vm0, %v27_v14  ;;  %255 = vmatpush.xpose.msk.msra.mxu1 %vm46_vm0, %v27_v14 }
  0x3e   :  { %238 = vmatpush.xpose.msk.msra.mxu0 %vm46_vm0, %v26_v15  ;;  %256 = vmatpush.xpose.msk.msra.mxu1 %vm46_vm0, %v26_v15 }
  0x41   :  { %239 = vmatmul.msk.f32.vlgmr.msra.gmra.mxu0 %vm46_vm0, %v24_v16  ;;  %240 = vmatmul.msk.f32.vlgmr.msra.gmra.mxu1 %vm46_vm0, %v25_v17 }
  0xbe   :  { %v118_v19 = vpop.f32.mrf.mxu0  ;;  %v121_v21 = vpop.f32.mrf.mxu1 }
  0xbf   :  { %v421_v20 = vadd.f32 %v265_v18, %v118_v19  ;;  %v424_v22 = vadd.f32 %v265_v18, %v121_v21 }
  0xc1   :  { %126 = vmax.xlane.f32.xlu0 %v421_v20 }
  0xc9   :  { %128 = vmax.xlane.f32.xlu0 %v424_v22 }
 0x134   :  { %v127_v27 = vpop.xlane.xlu0 %126 }
 0x135   :  { %v130_v28 = vmax.f32 %v124_v26, %v127_v27 }
 0x137   :  { %v134_v29 = vsub.f32 %v124_v26, %v130_v28  ;;  %167 = vst.msk [vmem:[#allocation2] sm:$0xff] %vm19_vm1, %v130_v28  ;;  %144 = vperm.xlu1 %263, %v130_v28  }
 0x139   :  { %v136_v42 = vmul.f32 1.442695, %v134_v29 }
 0x13c   :  { %v129_v31 = vpop.xlane.xlu0 %128 }
 0x13d   :  { %v131_v32 = vmax.f32 %v125_v30, %v129_v31 }
 0x13e   :  { %v178_v58 = vld [vmem:[#allocation2] sm:$0xff] }
 0x13f   :  { %v135_v33 = vsub.f32 %v125_v30, %v131_v32  ;;  %168 = vst.msk [vmem:[#allocation2 + $0x8] sm:$0xff] %vm19_vm1, %v131_v32  ;;  %149 = vperm.xlu1 %263, %v131_v32  }
 0x141   :  { %v138_v43 = vmul.f32 1.442695, %v135_v33 }
 0x146   :  { %v179_v62 = vld [vmem:[#allocation2 + $0x8] sm:$0xff] }
 0x1a9   :  { %v145_v34 = vpop.permute.xlu1 %144 }
 0x1aa   :  { %v152_v35 = vsub.f32 %v421_v20, %v145_v34 }
 0x1ac   :  { %v154_v36 = vmul.f32 1.442695, %v152_v35 }
 0x1ae   :  { %266 = vpow2.f32 %v154_v36 }
 0x1b1   :  { %v150_v37 = vpop.permute.xlu1 %149 }
 0x1b2   :  { %v153_v38 = vsub.f32 %v424_v22, %v150_v37 }
 0x1b4   :  { %v267_v39 = vpop.eup %266  ;;  %v156_v40 = vmul.f32 1.442695, %v153_v38 }
 0x1b5   :  { %158 = vadd.xlane.f32.xlu2 %v267_v39 }
 0x1b6   :  { %268 = vpow2.f32 %v156_v40 }
 0x1b7   :  { %270 = vpow2.f32 %v136_v42 }
 0x1b8   :  { %272 = vpow2.f32 %v138_v43 }
 0x1bc   :  { %v269_v41 = vpop.eup %268 }
 0x1bd   :  { %160 = vadd.xlane.f32.xlu2 %v269_v41  ;;  %v271_v44 = vpop.eup %270 }
 0x1be   :  { %v140_v46 = vmul.f32 %v271_v44, %v132_v45  ;;  %v273_v49 = vpop.eup %272 }
 0x1bf   :  { %v141_v51 = vmul.f32 %v273_v49, %v133_v50 }
 0x228   :  { %v159_v47 = vpop.xlane.xlu2 %158 }
 0x229   :  { %v162_v48 = vadd.f32 %v159_v47, %v140_v46 }
 0x22b   :  { %165 = vst.msk [vmem:[#allocation3] sm:$0xff] %vm19_vm1, %v162_v48 }
 0x230   :  { %v161_v52 = vpop.xlane.xlu2 %160 }
 0x231   :  { %v163_v53 = vadd.f32 %v161_v52, %v141_v51 }
 0x232   :  { %v180_v54 = vld [vmem:[#allocation3] sm:$0xff] }
 0x233   :  { %166 = vst.msk [vmem:[#allocation3 + $0x8] sm:$0xff] %vm19_vm1, %v163_v53  ;;  %274 = vlog2.f32 %v180_v54 }
 0x239   :  { %v275_v55 = vpop.eup %274 }
 0x23a   :  { %v183_v56 = vmul.f32 0.6931472, %v275_v55  ;;  %v181_v57 = vld [vmem:[#allocation3 + $0x8] sm:$0xff] }
 0x23b   :  { %276 = vlog2.f32 %v181_v57 }
 0x23c   :  { %v186_v59 = vadd.f32 %v183_v56, %v178_v58 }
 0x23e   :  { %192 = vperm.xlu0 %264, %v186_v59  }
 0x241   :  { %v277_v60 = vpop.eup %276 }
 0x242   :  { %v185_v61 = vmul.f32 0.6931472, %v277_v60 }
 0x244   :  { %v187_v63 = vadd.f32 %v185_v61, %v179_v62 }
 0x246   :  { %197 = vperm.xlu1 %263, %v187_v63  }
 0x2b0   :  { %v193_v0 = vpop.permute.xlu0 %192 }
 0x2b1   :  { %v200_v1 = vsub.f32 %v421_v20, %v193_v0 }
 0x2b3   :  { %202 = vst [vmem:[#allocation4] sm:$0xff] %v200_v1 }
 0x2b8   :  { %v198_v2 = vpop.permute.xlu1 %197 }
 0x2b9   :  { %v201_v3 = vsub.f32 %v424_v22, %v198_v2 }
 0x2bb   :  { %203 = vst [vmem:[#allocation4 + $0x8] sm:$0xff] %v201_v3 }
 0x2bc   :  { %216 = dma.vmem_to_hbm [thread:$0]  %s209_s1, 256, %s211_s24, [#allocation5], %s308_s25, %s308_s25, %s309_s26  }
 0x2bd   :  { %302 = dma.done.wait [#allocation5], 256  }
 0x2be   :  { %303 = vsyncadd [#allocation5], 4294967040 }
 0x2bf   :  { %221 = vsyncpa [#allocation5], 1 }

</bundles_post_ra>
